<compile_context>
chip_gen: v7x
topology: tpu7x:2x2x1
jax: 0.10.0
libtpu: 0.0.40
codegen_flags: <defaults>
</compile_context>

<pallas_src>
import math

import jax
import jax.numpy as jnp
from jax.experimental import pallas as pl
from jax.experimental.pallas import tpu as pltpu


def _copy_kernel(x_ref, o_ref):
    o_ref[...] = x_ref[...]


def _round_up(x, m):
    return ((x + m - 1) // m) * m


def contiguous(x):
    """Pallas equivalent of torch.Tensor.contiguous(): a dense copy of x."""
    orig_shape = x.shape
    dtype = x.dtype
    n = math.prod(orig_shape) if orig_shape else 1
    if n == 0:
        return x  # nothing to copy

    itemsize = jnp.dtype(dtype).itemsize
    # sublane packing: 8 rows/vreg for 32-bit, 16 for 16-bit, 32 for 8-bit
    sub = 8 * max(1, 4 // itemsize)

    # Lane-dense width that *divides* n exactly -> reshape is free, no pad.
    width = None
    for w in (1024, 512, 256, 128):
        if n % w == 0:
            width = w
            break
    if width is None:
        # Ragged total size: use the natural 2-D view (collapse leading dims,
        # keep the full last dim) so no padding is ever required.  The last
        # block dim equals the full array dim, which is always a legal block.
        width = orig_shape[-1] if len(orig_shape) >= 2 else n
    rows = n // width
    row_bytes = width * itemsize

    # Dtype-aware tile sizing in bytes (~4 MiB per block).
    tile_bytes = 4 << 20
    tm = max(sub, (tile_bytes // row_bytes) // sub * sub)

    if tm >= rows:
        # Whole array fits in one block.  Split in two for v7x megacore if
        # each half is still a reasonably large tile, else take it whole.
        half = _round_up(pl.cdiv(rows, 2), sub)
        if half < rows and half * row_bytes >= (512 << 10):
            tm = half
        else:
            tm = rows  # single full block (block dim == array dim is legal)

    grid = (pl.cdiv(rows, tm),)  # partial last block is masked by Pallas

    a2d = x.reshape(rows, width)  # free reshape (divides exactly, no pad)

    out2d = pl.pallas_call(
        _copy_kernel,
        out_shape=jax.ShapeDtypeStruct((rows, width), dtype),
        grid=grid,
        in_specs=[pl.BlockSpec((tm, width), lambda i: (i, 0))],
        out_specs=pl.BlockSpec((tm, width), lambda i: (i, 0)),
        compiler_params=pltpu.CompilerParams(
            dimension_semantics=("parallel",),
            vmem_limit_bytes=32 * 1024 * 1024,
        ),
        cost_estimate=pl.CostEstimate(
            flops=0, transcendentals=0, bytes_accessed=2 * n * itemsize),
    )(a2d)

    return out2d.reshape(orig_shape)


if __name__ == "__main__":
    key = jax.random.PRNGKey(0)
    x = jax.random.normal(key, (2, 4, 16, 16), jnp.float32)

    fwd = jax.jit(contiguous)
    y = fwd(x)
    jax.block_until_ready(y)

    assert y.shape == x.shape
    assert y.dtype == x.dtype
    assert bool(jnp.all(y == x))  # .contiguous() is value-identity
    print("KERNEL_OK")
</pallas_src>

<mosaic_0001>
module attributes {stable_mosaic.version = 11 : i64} {
  func.func @_copy_kernel(%arg0: i32, %arg1: memref<2x1024xf32, #tpu.memory_space<vmem>>, %arg2: memref<2x1024xf32, #tpu.memory_space<vmem>>) attributes {dimension_semantics = [#tpu.dimension_semantics<parallel>], iteration_bounds = array<i64: 1>, scalar_prefetch = 0 : i64, scratch_operands = 0 : i64, tpu.core_type = #tpu.core_type<tc>, window_params = [{transform_indices = @transform_0, window_bounds = array<i64: 2, 1024>}, {transform_indices = @transform_1, window_bounds = array<i64: 2, 1024>}]} {
    %c0 = arith.constant 0 : index
    %c0_0 = arith.constant 0 : index
    %0 = vector.load %arg1[%c0, %c0_0] : memref<2x1024xf32, #tpu.memory_space<vmem>>, vector<2x1024xf32>
    %c0_1 = arith.constant 0 : index
    %c0_2 = arith.constant 0 : index
    %1 = vector.load %arg2[%c0_1, %c0_2] : memref<2x1024xf32, #tpu.memory_space<vmem>>, vector<2x1024xf32>
    tpu.vector_store %arg2[%c0_1, %c0_2], %0 {strides = array<i32>} : memref<2x1024xf32, #tpu.memory_space<vmem>>, vector<2x1024xf32>,
    return
  }
  func.func @transform_0(%arg0: i32) -> (i32, i32) {
    %c0_i32 = arith.constant 0 : i32
    %c0_i32_0 = arith.constant 0 : i32
    return %arg0, %c0_i32 : i32, i32
  }
  func.func @transform_1(%arg0: i32) -> (i32, i32) {
    %c0_i32 = arith.constant 0 : i32
    %c0_i32_0 = arith.constant 0 : i32
    return %arg0, %c0_i32 : i32, i32
  }
}

</mosaic_0001>

<bundles_post_ra>
// kernel: contiguous.1
= control target key start
LH: loop header
LB: loop body
LE: loop exit
PB: predicated region body
PF: predicated region fallthrough
CT: control target
= control target key end

     0   :  { %s38_s0 = inlined_call_operand.vmem [shape: f32[2,1024], index: 0, kind: input, shape index: {}]   ;;  %s39_s1 = inlined_call_operand.vmem [shape: f32[2,1024], index: 1, kind: output, shape index: {}]  }
   0x1   :  { %v8_v0 = vld [vmem:[%s38_s0] sm:$0xff]  ;;  %v9_v1 = vld [vmem:[%s38_s0 + $0x8] sm:$0xff] }
   0x2   :  { %10 = vst [vmem:[%s39_s1] sm:$0xff] %v8_v0  ;;  %11 = vst [vmem:[%s39_s1 + $0x8] sm:$0xff] %v9_v1 }

</bundles_post_ra>
